<compile_context>
chip_gen: v6e
topology: v6e:2x2x1
jax: 0.10.0
libtpu: 0.0.40
codegen_flags: <defaults>
</compile_context>

<pallas_src>
import jax
import jax.numpy as jnp
from jax.experimental import pallas as pl
from jax.experimental.pallas import tpu as pltpu


def _round_up(x, m):
    return ((x + m - 1) // m) * m


def mlp_kernel(x_ref, w1_ref, b1_ref, w2_ref, b2_ref, w3_ref, b3_ref, out_ref):
    # Cast activations to the MXU compute dtype in-kernel (x is read from HBM once, as f32).
    x = x_ref[...].astype(w1_ref.dtype)
    # Layer 1: MXU matmul with f32 accumulation; bias + ReLU in f32 on the VPU.
    h1 = jnp.dot(x, w1_ref[...], preferred_element_type=jnp.float32)
    h1 = jnp.maximum(h1 + b1_ref[...], 0.0)
    # Layer 2
    h2 = jnp.dot(h1.astype(w2_ref.dtype), w2_ref[...], preferred_element_type=jnp.float32)
    h2 = jnp.maximum(h2 + b2_ref[...], 0.0)
    # Layer 3 (Q-values, no activation)
    q = jnp.dot(h2.astype(w3_ref.dtype), w3_ref[...], preferred_element_type=jnp.float32)
    out_ref[...] = (q + b3_ref[...]).astype(out_ref.dtype)


def prepare_params(params, *, compute_dtype=jnp.bfloat16):
    """One-time parameter preprocessing (hoisted out of the per-call path).

    Pads the hidden dims (fc1, fc2) up to multiples of 128 lanes with zeros and casts the
    weights to `compute_dtype`. Padding is numerically exact: zero weight columns/rows plus
    zero bias through ReLU contribute nothing to the real outputs. Biases stay f32.
    """
    w1, b1, w2, b2, w3, b3 = params
    f1, f2 = w1.shape[1], w2.shape[1]
    f1p, f2p = _round_up(f1, 128), _round_up(f2, 128)

    w1p = jnp.pad(w1, ((0, 0), (0, f1p - f1))).astype(compute_dtype)
    b1p = jnp.pad(b1, ((0, 0), (0, f1p - f1))).astype(jnp.float32)
    w2p = jnp.pad(w2, ((0, f1p - f1), (0, f2p - f2))).astype(compute_dtype)
    b2p = jnp.pad(b2, ((0, 0), (0, f2p - f2))).astype(jnp.float32)
    w3p = jnp.pad(w3, ((0, f2p - f2), (0, 0))).astype(compute_dtype)
    b3p = b3.astype(jnp.float32)
    return (w1p, b1p, w2p, b2p, w3p, b3p)


def _choose_tm(batch, tm_max, num_batch_shards):
    if batch <= 8:
        return batch                          # single full-dim block (always legal)
    tm = min(tm_max, (batch // 8) * 8)        # sublane-aligned batch tile
    if num_batch_shards > 1:                  # keep >= num_batch_shards grid steps (v7x: 2 TCs)
        per_shard = _round_up(-(-batch // num_batch_shards), 8)
        tm = min(tm, per_shard)
    return max(tm, 8)


def model_forward(state, prepared, *, tm=512, num_batch_shards=1):
    """Fused 3-layer MLP forward in one pallas_call.

    state: (B, input_dims) float32, used as-is (no wrapper pad/cast).
    prepared: output of prepare_params().
    tm: max batch rows per grid step (512 is near the HBM roofline sweet spot; 128 also
        fine on v5e for small batches).
    num_batch_shards: set to 2 on v7x so the "parallel" batch axis feeds both TensorCores.
    """
    w1, b1, w2, b2, w3, b3 = prepared
    B, d_in = state.shape
    n_actions = w3.shape[1]

    tm = _choose_tm(B, tm, num_batch_shards)
    grid = (pl.cdiv(B, tm),)                  # ragged last block is masked by Pallas

    def resident(arr):                        # params: constant index_map -> stay in VMEM
        return pl.BlockSpec(arr.shape, lambda i: (0, 0))

    param_bytes = sum(int(p.size) * p.dtype.itemsize for p in prepared)
    cost = pl.CostEstimate(
        flops=2 * B * (d_in * w1.shape[1] + w2.shape[0] * w2.shape[1]
                       + w3.shape[0] * n_actions),
        transcendentals=0,
        bytes_accessed=int(state.size) * state.dtype.itemsize
                       + B * n_actions * 4 + param_bytes,
    )

    return pl.pallas_call(
        mlp_kernel,
        out_shape=jax.ShapeDtypeStruct((B, n_actions), jnp.float32),
        grid_spec=pl.GridSpec(
            grid=grid,
            in_specs=[
                pl.BlockSpec((tm, d_in), lambda i: (i, 0)),   # x: tiled over batch
                resident(w1), resident(b1),
                resident(w2), resident(b2),
                resident(w3), resident(b3),
            ],
            out_specs=pl.BlockSpec((tm, n_actions), lambda i: (i, 0)),
        ),
        compiler_params=pltpu.CompilerParams(
            dimension_semantics=("parallel",),   # batch tiles shard across TCs on v7x
        ),
        cost_estimate=cost,
    )(state, w1, b1, w2, b2, w3, b3)


def init_params(key, input_dims, fc1_dims, fc2_dims, n_actions):
    """Deterministic init mirroring nn.Linear's U(-1/sqrt(fan_in), 1/sqrt(fan_in))."""
    def linear(k, fan_in, fan_out):
        kw, kb = jax.random.split(k)
        bound = 1.0 / jnp.sqrt(fan_in)
        w = jax.random.uniform(kw, (fan_in, fan_out), jnp.float32, -bound, bound)
        b = jax.random.uniform(kb, (1, fan_out), jnp.float32, -bound, bound)
        return w, b

    k1, k2, k3 = jax.random.split(key, 3)
    w1, b1 = linear(k1, input_dims, fc1_dims)
    w2, b2 = linear(k2, fc1_dims, fc2_dims)
    w3, b3 = linear(k3, fc2_dims, n_actions)
    return (w1, b1, w2, b2, w3, b3)


if __name__ == "__main__":
    # Small shapes consistent with a DQN-style MLP
    batch, input_dims, fc1_dims, fc2_dims, n_actions = 2, 8, 32, 32, 4

    key = jax.random.PRNGKey(0)
    k_state, k_params, k_big = jax.random.split(key, 3)
    state = jax.random.normal(k_state, (batch, input_dims), jnp.float32)
    params = init_params(k_params, input_dims, fc1_dims, fc2_dims, n_actions)

    # Reference in plain JAX (same math as the PyTorch forward), f32 throughout.
    w1, b1, w2, b2, w3, b3 = params
    def ref_fwd(s):
        h = jnp.maximum(s @ w1 + b1, 0.0)
        h = jnp.maximum(h @ w2 + b2, 0.0)
        return h @ w3 + b3

    # Exact path (f32 matmuls) — must match the reference tightly.
    prepared_f32 = prepare_params(params, compute_dtype=jnp.float32)
    out_f32 = jax.block_until_ready(model_forward(state, prepared_f32))
    assert out_f32.shape == (batch, n_actions)
    assert jnp.allclose(out_f32, ref_fwd(state), atol=1e-5, rtol=1e-5), "f32 path mismatch"

    # Fast path (bf16 MXU matmuls, f32 accumulation) — relaxed tolerance.
    prepared_bf16 = prepare_params(params, compute_dtype=jnp.bfloat16)
    out_bf16 = jax.block_until_ready(model_forward(state, prepared_bf16))
    assert out_bf16.shape == (batch, n_actions)
    assert jnp.allclose(out_bf16, ref_fwd(state), atol=5e-2, rtol=5e-2), "bf16 path mismatch"

    # Multi-tile + ragged-batch path (grid > 1, clipped last block), exact f32 check.
    big_state = jax.random.normal(k_big, (37, input_dims), jnp.float32)
    out_big = jax.block_until_ready(model_forward(big_state, prepared_f32, tm=16))
    assert out_big.shape == (37, n_actions)
    assert jnp.allclose(out_big, ref_fwd(big_state), atol=1e-4, rtol=1e-4), "ragged path mismatch"

    print("KERNEL_OK")
</pallas_src>

<mosaic_0001>
module attributes {stable_mosaic.version = 11 : i64} {
  func.func @mlp_kernel(%arg0: i32, %arg1: memref<2x8xf32, #tpu.memory_space<vmem>>, %arg2: memref<8x128xf32, #tpu.memory_space<vmem>>, %arg3: memref<1x128xf32, #tpu.memory_space<vmem>>, %arg4: memref<128x128xf32, #tpu.memory_space<vmem>>, %arg5: memref<1x128xf32, #tpu.memory_space<vmem>>, %arg6: memref<128x4xf32, #tpu.memory_space<vmem>>, %arg7: memref<1x4xf32, #tpu.memory_space<vmem>>, %arg8: memref<2x4xf32, #tpu.memory_space<vmem>>) attributes {dimension_semantics = [#tpu.dimension_semantics<parallel>], iteration_bounds = array<i64: 1>, scalar_prefetch = 0 : i64, scratch_operands = 0 : i64, tpu.core_type = #tpu.core_type<tc>, window_params = [{transform_indices = @transform_0, window_bounds = array<i64: 2, 8>}, {pipeline_mode = #tpu.pipeline_mode<synchronous>, transform_indices = @transform_1, window_bounds = array<i64: 8, 128>}, {pipeline_mode = #tpu.pipeline_mode<synchronous>, transform_indices = @transform_2, window_bounds = array<i64: 1, 128>}, {pipeline_mode = #tpu.pipeline_mode<synchronous>, transform_indices = @transform_3, window_bounds = array<i64: 128, 128>}, {pipeline_mode = #tpu.pipeline_mode<synchronous>, transform_indices = @transform_4, window_bounds = array<i64: 1, 128>}, {pipeline_mode = #tpu.pipeline_mode<synchronous>, transform_indices = @transform_5, window_bounds = array<i64: 128, 4>}, {pipeline_mode = #tpu.pipeline_mode<synchronous>, transform_indices = @transform_6, window_bounds = array<i64: 1, 4>}, {transform_indices = @transform_7, window_bounds = array<i64: 2, 4>}]} {
    %c0 = arith.constant 0 : index
    %c0_0 = arith.constant 0 : index
    %0 = vector.load %arg1[%c0, %c0_0] : memref<2x8xf32, #tpu.memory_space<vmem>>, vector<2x8xf32>
    %c0_1 = arith.constant 0 : index
    %c0_2 = arith.constant 0 : index
    %1 = vector.load %arg2[%c0_1, %c0_2] : memref<8x128xf32, #tpu.memory_space<vmem>>, vector<8x128xf32>
    %cst = arith.constant dense<0.000000e+00> : vector<2x128xf32>
    %2 = tpu.matmul %0, %1, %cst {dimension_numbers = #tpu.dot_dimension_numbers<[1], [0], [0], [1], [0, 0, 1, 1], [], []>} : vector<2x8xf32>, vector<8x128xf32>, vector<2x128xf32> -> vector<2x128xf32>
    %c0_3 = arith.constant 0 : index
    %c0_4 = arith.constant 0 : index
    %3 = vector.load %arg3[%c0_3, %c0_4] : memref<1x128xf32, #tpu.memory_space<vmem>>, vector<1x128xf32>
    %4 = vector.broadcast %3 : vector<1x128xf32> to vector<2x128xf32>
    %5 = arith.addf %2, %4 : vector<2x128xf32>
    %cst_5 = arith.constant 0.000000e+00 : f32
    %6 = vector.broadcast %cst_5 : f32 to vector<2x128xf32>
    %7 = arith.maximumf %5, %6 : vector<2x128xf32>
    %c0_6 = arith.constant 0 : index
    %c0_7 = arith.constant 0 : index
    %8 = vector.load %arg4[%c0_6, %c0_7] : memref<128x128xf32, #tpu.memory_space<vmem>>, vector<128x128xf32>
    %cst_8 = arith.constant dense<0.000000e+00> : vector<2x128xf32>
    %9 = tpu.matmul %7, %8, %cst_8 {dimension_numbers = #tpu.dot_dimension_numbers<[1], [0], [0], [1], [0, 0, 1, 1], [], []>} : vector<2x128xf32>, vector<128x128xf32>, vector<2x128xf32> -> vector<2x128xf32>
    %c0_9 = arith.constant 0 : index
    %c0_10 = arith.constant 0 : index
    %10 = vector.load %arg5[%c0_9, %c0_10] : memref<1x128xf32, #tpu.memory_space<vmem>>, vector<1x128xf32>
    %11 = vector.broadcast %10 : vector<1x128xf32> to vector<2x128xf32>
    %12 = arith.addf %9, %11 : vector<2x128xf32>
    %cst_11 = arith.constant 0.000000e+00 : f32
    %13 = vector.broadcast %cst_11 : f32 to vector<2x128xf32>
    %14 = arith.maximumf %12, %13 : vector<2x128xf32>
    %c0_12 = arith.constant 0 : index
    %c0_13 = arith.constant 0 : index
    %15 = vector.load %arg6[%c0_12, %c0_13] : memref<128x4xf32, #tpu.memory_space<vmem>>, vector<128x4xf32>
    %cst_14 = arith.constant dense<0.000000e+00> : vector<2x4xf32>
    %16 = tpu.matmul %14, %15, %cst_14 {dimension_numbers = #tpu.dot_dimension_numbers<[1], [0], [0], [1], [0, 0, 1, 1], [], []>} : vector<2x128xf32>, vector<128x4xf32>, vector<2x4xf32> -> vector<2x4xf32>
    %c0_15 = arith.constant 0 : index
    %c0_16 = arith.constant 0 : index
    %17 = vector.load %arg7[%c0_15, %c0_16] : memref<1x4xf32, #tpu.memory_space<vmem>>, vector<1x4xf32>
    %18 = vector.broadcast %17 : vector<1x4xf32> to vector<2x4xf32>
    %19 = arith.addf %16, %18 : vector<2x4xf32>
    %c0_17 = arith.constant 0 : index
    %c0_18 = arith.constant 0 : index
    %20 = vector.load %arg8[%c0_17, %c0_18] : memref<2x4xf32, #tpu.memory_space<vmem>>, vector<2x4xf32>
    tpu.vector_store %arg8[%c0_17, %c0_18], %19 {strides = array<i32>} : memref<2x4xf32, #tpu.memory_space<vmem>>, vector<2x4xf32>,
    return
  }
  func.func @transform_0(%arg0: i32) -> (i32, i32) {
    %c0_i32 = arith.constant 0 : i32
    %c0_i32_0 = arith.constant 0 : i32
    return %arg0, %c0_i32 : i32, i32
  }
  func.func @transform_1(%arg0: i32) -> (i32, i32) {
    %c0_i32 = arith.constant 0 : i32
    %c0_i32_0 = arith.constant 0 : i32
    %c0_i32_1 = arith.constant 0 : i32
    return %c0_i32, %c0_i32_0 : i32, i32
  }
  func.func @transform_2(%arg0: i32) -> (i32, i32) {
    %c0_i32 = arith.constant 0 : i32
    %c0_i32_0 = arith.constant 0 : i32
    %c0_i32_1 = arith.constant 0 : i32
    return %c0_i32, %c0_i32_0 : i32, i32
  }
  func.func @transform_3(%arg0: i32) -> (i32, i32) {
    %c0_i32 = arith.constant 0 : i32
    %c0_i32_0 = arith.constant 0 : i32
    %c0_i32_1 = arith.constant 0 : i32
    return %c0_i32, %c0_i32_0 : i32, i32
  }
  func.func @transform_4(%arg0: i32) -> (i32, i32) {
    %c0_i32 = arith.constant 0 : i32
    %c0_i32_0 = arith.constant 0 : i32
    %c0_i32_1 = arith.constant 0 : i32
    return %c0_i32, %c0_i32_0 : i32, i32
  }
  func.func @transform_5(%arg0: i32) -> (i32, i32) {
    %c0_i32 = arith.constant 0 : i32
    %c0_i32_0 = arith.constant 0 : i32
    %c0_i32_1 = arith.constant 0 : i32
    return %c0_i32, %c0_i32_0 : i32, i32
  }
  func.func @transform_6(%arg0: i32) -> (i32, i32) {
    %c0_i32 = arith.constant 0 : i32
    %c0_i32_0 = arith.constant 0 : i32
    %c0_i32_1 = arith.constant 0 : i32
    return %c0_i32, %c0_i32_0 : i32, i32
  }
  func.func @transform_7(%arg0: i32) -> (i32, i32) {
    %c0_i32 = arith.constant 0 : i32
    %c0_i32_0 = arith.constant 0 : i32
    return %arg0, %c0_i32 : i32, i32
  }
}

</mosaic_0001>

<bundles_post_ra>
// kernel: tpu_custom_call.1
= control target key start
LH: loop header
LB: loop body
LE: loop exit
PB: predicated region body
PF: predicated region fallthrough
CT: control target
= control target key end

     0   :  { %12 = vsyncpa [#allocation3], 0  ;;  %s724_s0 = inlined_call_operand.hbm [shape: f32[2,8], index: 0, kind: input, shape index: {}]   ;;  %s725_s1 = inlined_call_operand.vmem [shape: f32[8,128], index: 1, kind: input, shape index: {}]   ;;  %s726_s2 = inlined_call_operand.vmem [shape: f32[1,128], index: 2, kind: input, shape index: {}]   ;;  %s727_s3 = inlined_call_operand.vmem [shape: f32[128,128], index: 3, kind: input, shape index: {}]   ;;  %s728_s4 = inlined_call_operand.hbm [shape: f32[1,128], index: 4, kind: input, shape index: {}]   ;;  %s729_s5 = inlined_call_operand.vmem [shape: f32[128,4], index: 5, kind: input, shape index: {}]   ;;  %s730_s6 = inlined_call_operand.vmem [shape: f32[1,4], index: 6, kind: input, shape index: {}]   ;;  %s731_s7 = inlined_call_operand.hbm [shape: f32[2,4], index: 7, kind: output, shape index: {}]  }
   0x1   :  { %13 = vsyncpa [#allocation6], 0 }
   0x2   :  { %14 = vsyncpa [#allocation4], 0  ;;  %s526_s24 = smov [#allocation2]   ;;  %s527_s26 = smov [#allocation5]  }
   0x3   :  { %s21_s25 = sshll.u32 %s526_s24, 4  ;;  %s37_s27 = sshll.u32 %s527_s26, 4  ;;  %s22_s25 = int_to_ptr.vmem [resolvable:$true] %s21_s25  ;;  %s38_s27 = int_to_ptr.vmem [resolvable:$true] %s37_s27 }
   0x4   :  { %s468_s28 = scalar_lea.vmem %s22_s25, 32  ;;  %p473_p1 = scmp.lt.s32.totalorder %s22_s25, %s22_s25 }
   0x5   :  { %p469_p0 = scmp.ne.s32.totalorder %s22_s25, %s468_s28  ;;  %p474_p2 = scmp.lt.s32.totalorder %s468_s28, %s468_s28 }
   0x7   :  { %p475_p3 = por %p474_p2, %p473_p1 }
   0x9   :  { %p476_p4 = pnand %p475_p3, %p469_p0 }
   0xb   :  { %479 = shalt.err (!%p476_p4)
}
   0xc   :  { %24 = dma.hbm_to_vmem [thread:$0]  %s724_s0, 32, %s22_s25, [#allocation3]  }
   0xd   :  { %s488_s8 = scalar_lea.vmem %s38_s27, 16  ;;  %s492_s9 = scalar_lea.vmem %s38_s27, 32 }
   0xe   :  { %p489_p5 = scmp.ne.s32.totalorder %s38_s27, %s488_s8  ;;  %p493_p6 = scmp.lt.s32.totalorder %s38_s27, %s38_s27 }
   0xf   :  { %p494_p7 = scmp.lt.s32.totalorder %s492_s9, %s488_s8 }
  0x11   :  { %p495_p8 = por %p494_p7, %p493_p6 }
  0x13   :  { %p496_p9 = pnand %p495_p8, %p489_p5 }
  0x15   :  { %499 = shalt.err (!%p496_p9)
}
  0x16   :  { %40 = dma.hbm_to_vmem [thread:$0]  %s728_s4, 16, %s38_s27, [#allocation6]  }
  0x17   :  { %520 = dma.done.wait [#allocation3], 32  }
  0x18   :  { %521 = vsyncadd [#allocation3], 4294967264 }
  0x19   :  { %522 = dma.done.wait [#allocation6], 16  }
  0x1a   :  { %523 = vsyncadd [#allocation6], 4294967280  ;;  %v528_v0 = vmov 0.0   ;;  %vm529_vm0 = vmmov 0   ;;  %vm60_vm1 = vcmask 64512   ;;  %v52_v1 = vld [vmem:[%s725_s1] sm:$0xff] }
  0x1b   :  { %380 = vmatprep.subr.mxu0 %v528_v0  ;;  %382 = vmatprep.mubr.msk.f32.mxu0 %vm529_vm0, %v528_v0  ;;  %v51_v2 = vld [vmem:[#allocation2] sm:$0x3]  ;;  %v150_v3 = vld [vmem:[%s727_s3 + $0x78] sm:$0xff]  ;;  %v149_v4 = vld [vmem:[%s727_s3 + $0x70] sm:$0xff]  ;;  %s530_s24 = smov [#allocation7]   ;;  %vm322_vm2 = vcmask 25600  }
  0x1c   :  { %385 = vmatprep.subr.mxu1 %v528_v0  ;;  %417 = vmatprep.mubr.msk.f32.mxu1 %vm529_vm0, %v528_v0  ;;  %v148_v5 = vld [vmem:[%s727_s3 + $0x68] sm:$0xff]  ;;  %v147_v6 = vld [vmem:[%s727_s3 + $0x60] sm:$0xff]  ;;  %v146_v7 = vld [vmem:[%s727_s3 + $0x58] sm:$0xff]  ;;  %s330_s25 = sshll.u32 %s530_s24, 4  ;;  %s331_s25 = int_to_ptr.vmem [resolvable:$true] %s330_s25 }
  0x1d   :  { %381 = vmatpush3.msra.mxu0 %v52_v1  ;;  %386 = vmatpush3.msra.mxu1 %v150_v3  ;;  %v145_v8 = vld [vmem:[%s727_s3 + $0x50] sm:$0xff]  ;;  %v144_v9 = vld [vmem:[%s727_s3 + $0x48] sm:$0xff]  ;;  %v143_v10 = vld [vmem:[%s727_s3 + $0x40] sm:$0xff]  ;;  %p505_p11 = scmp.lt.s32.totalorder %s331_s25, %s331_s25 }
  0x1e   :  { %383 = vmatmul.mubr.msk.f32.vlgmr.msra.gmra.mxu0 %vm60_vm1, %v51_v2  ;;  %387 = vmatprep.subr.mxu1 %v528_v0  ;;  %v142_v11 = vld [vmem:[%s727_s3 + $0x38] sm:$0xff]  ;;  %v141_v12 = vld [vmem:[%s727_s3 + $0x30] sm:$0xff]  ;;  %v140_v13 = vld [vmem:[%s727_s3 + $0x28] sm:$0xff] }
  0x1f   :  { %388 = vmatpush3.msra.mxu1 %v149_v4  ;;  %420 = vmatprep.subr.mxu0 %v528_v0  ;;  %v139_v14 = vld [vmem:[%s727_s3 + $0x20] sm:$0xff]  ;;  %v138_v15 = vld [vmem:[%s727_s3 + $0x18] sm:$0xff]  ;;  %v137_v16 = vld [vmem:[%s727_s3 + $0x10] sm:$0xff] }
  0x20   :  { %389 = vmatprep.subr.mxu1 %v528_v0  ;;  %452 = vmatprep.mubr.msk.f32.mxu0 %vm529_vm0, %v528_v0  ;;  %v136_v17 = vld [vmem:[%s727_s3 + $0x8] sm:$0xff]  ;;  %v135_v18 = vld [vmem:[%s727_s3] sm:$0xff]  ;;  %v244_v19 = vld [vmem:[%s729_s5 + $0x78] sm:$0xff] }
  0x21   :  { %390 = vmatpush3.msra.mxu1 %v148_v5  ;;  %v243_v20 = vld [vmem:[%s729_s5 + $0x70] sm:$0xff]  ;;  %421 = vmatpush3.msra.mxu0 %v244_v19  ;;  %v242_v21 = vld [vmem:[%s729_s5 + $0x68] sm:$0xff]  ;;  %v241_v22 = vld [vmem:[%s729_s5 + $0x60] sm:$0xff] }
  0x22   :  { %391 = vmatprep.subr.mxu1 %v528_v0  ;;  %422 = vmatprep.subr.mxu0 %v528_v0  ;;  %v240_v23 = vld [vmem:[%s729_s5 + $0x58] sm:$0xff]  ;;  %v239_v24 = vld [vmem:[%s729_s5 + $0x50] sm:$0xff]  ;;  %v238_v25 = vld [vmem:[%s729_s5 + $0x48] sm:$0xff] }
  0x23   :  { %392 = vmatpush3.msra.mxu1 %v147_v6  ;;  %423 = vmatpush3.msra.mxu0 %v243_v20  ;;  %v237_v26 = vld [vmem:[%s729_s5 + $0x40] sm:$0xff]  ;;  %v236_v27 = vld [vmem:[%s729_s5 + $0x38] sm:$0xff]  ;;  %v235_v28 = vld [vmem:[%s729_s5 + $0x30] sm:$0xff] }
  0x24   :  { %393 = vmatprep.subr.mxu1 %v528_v0  ;;  %424 = vmatprep.subr.mxu0 %v528_v0  ;;  %v234_v29 = vld [vmem:[%s729_s5 + $0x28] sm:$0xff]  ;;  %v233_v30 = vld [vmem:[%s729_s5 + $0x20] sm:$0xff]  ;;  %v232_v31 = vld [vmem:[%s729_s5 + $0x18] sm:$0xff] }
  0x25   :  { %394 = vmatpush3.msra.mxu1 %v146_v7  ;;  %425 = vmatpush3.msra.mxu0 %v242_v21  ;;  %v340_v32 = vld [vmem:[%s726_s2] ss:$0 sm:$0xff]  ;;  %v231_v37 = vld [vmem:[%s729_s5 + $0x10] sm:$0xff]  ;;  %v230_v38 = vld [vmem:[%s729_s5 + $0x8] sm:$0xff] }
  0x26   :  { %395 = vmatprep.subr.mxu1 %v528_v0  ;;  %426 = vmatprep.subr.mxu0 %v528_v0  ;;  %v229_v39 = vld [vmem:[%s729_s5] sm:$0xff]  ;;  %s500_s5 = scalar_lea.vmem %s331_s25, 32 }
  0x27   :  { %396 = vmatpush3.msra.mxu1 %v145_v8  ;;  %427 = vmatpush3.msra.mxu0 %v241_v22  ;;  %v342_v40 = vld [vmem:[#allocation5] ss:$0 sm:$0xff]  ;;  %v343_v45 = vld [vmem:[%s730_s6] ss:$0 sm:$0xff]  ;;  %p501_p10 = scmp.ne.s32.totalorder %s331_s25, %s500_s5  ;;  %p506_p12 = scmp.lt.s32.totalorder %s500_s5, %s500_s5 }
  0x28   :  { %397 = vmatprep.subr.mxu1 %v528_v0  ;;  %428 = vmatprep.subr.mxu0 %v528_v0 }
  0x29   :  { %398 = vmatpush3.msra.mxu1 %v144_v9  ;;  %429 = vmatpush3.msra.mxu0 %v240_v23  ;;  %p507_p13 = por %p506_p12, %p505_p11 }
  0x2a   :  { %399 = vmatprep.subr.mxu1 %v528_v0  ;;  %430 = vmatprep.subr.mxu0 %v528_v0 }
  0x2b   :  { %400 = vmatpush3.msra.mxu1 %v143_v10  ;;  %431 = vmatpush3.msra.mxu0 %v239_v24  ;;  %p508_p0 = pnand %p507_p13, %p501_p10 }
  0x2c   :  { %401 = vmatprep.subr.mxu1 %v528_v0  ;;  %432 = vmatprep.subr.mxu0 %v528_v0 }
  0x2d   :  { %402 = vmatpush3.msra.mxu1 %v142_v11  ;;  %433 = vmatpush3.msra.mxu0 %v238_v25 }
  0x2e   :  { %403 = vmatprep.subr.mxu1 %v528_v0  ;;  %434 = vmatprep.subr.mxu0 %v528_v0 }
  0x2f   :  { %404 = vmatpush3.msra.mxu1 %v141_v12  ;;  %435 = vmatpush3.msra.mxu0 %v237_v26 }
  0x30   :  { %405 = vmatprep.subr.mxu1 %v528_v0  ;;  %436 = vmatprep.subr.mxu0 %v528_v0 }
  0x31   :  { %406 = vmatpush3.msra.mxu1 %v140_v13  ;;  %437 = vmatpush3.msra.mxu0 %v236_v27 }
  0x32   :  { %407 = vmatprep.subr.mxu1 %v528_v0  ;;  %438 = vmatprep.subr.mxu0 %v528_v0 }
  0x33   :  { %408 = vmatpush3.msra.mxu1 %v139_v14  ;;  %439 = vmatpush3.msra.mxu0 %v235_v28 }
  0x34   :  { %409 = vmatprep.subr.mxu1 %v528_v0  ;;  %440 = vmatprep.subr.mxu0 %v528_v0 }
  0x35   :  { %410 = vmatpush3.msra.mxu1 %v138_v15  ;;  %441 = vmatpush3.msra.mxu0 %v234_v29 }
  0x36   :  { %411 = vmatprep.subr.mxu1 %v528_v0  ;;  %442 = vmatprep.subr.mxu0 %v528_v0 }
  0x37   :  { %412 = vmatpush3.msra.mxu1 %v137_v16  ;;  %443 = vmatpush3.msra.mxu0 %v233_v30 }
  0x38   :  { %413 = vmatprep.subr.mxu1 %v528_v0  ;;  %444 = vmatprep.subr.mxu0 %v528_v0 }
  0x39   :  { %414 = vmatpush3.msra.mxu1 %v136_v17  ;;  %445 = vmatpush3.msra.mxu0 %v232_v31 }
  0x3a   :  { %415 = vmatprep.subr.mxu1 %v528_v0  ;;  %446 = vmatprep.subr.mxu0 %v528_v0 }
  0x3b   :  { %416 = vmatpush3.msra.mxu1 %v135_v18  ;;  %447 = vmatpush3.msra.mxu0 %v231_v37 }
  0x3c   :  { %448 = vmatprep.subr.mxu0 %v528_v0 }
  0x3d   :  { %449 = vmatpush3.msra.mxu0 %v230_v38 }
  0x3e   :  { %450 = vmatprep.subr.mxu0 %v528_v0 }
  0x3f   :  { %451 = vmatpush3.msra.mxu0 %v229_v39 }
  0xde   :  { %v130_v33 = vpop.f32.mrf.mxu0 }
  0xdf   :  { %v131_v34 = vadd.f32 %v340_v32, %v130_v33 }
  0xe0   :  { %v384_v35 = vpop.f32.mrf.mxu0 }
  0xe1   :  { %v134_v36 = vmax.f32 %v131_v34, 0.0 }
  0xe3   :  { %418 = vmatmul.mubr.f32.vlgmr.msra.gmra.mxu1 %v134_v36 }
 0x1a3   :  { %v224_v41 = vpop.f32.mrf.mxu1 }
 0x1a4   :  { %v225_v42 = vadd.f32 %v342_v40, %v224_v41 }
 0x1a5   :  { %v419_v43 = vpop.f32.mrf.mxu1 }
 0x1a6   :  { %v228_v44 = vmax.f32 %v225_v42, 0.0 }
 0x1a8   :  { %453 = vmatmul.mubr.f32.vlgmr.msra.gmra.mxu0 %v228_v44 }
 0x268   :  { %v318_v46 = vpop.f32.mrf.mxu0 }
 0x269   :  { %v319_v47 = vadd.f32 %v343_v45, %v318_v46 }
 0x26a   :  { %v454_v48 = vpop.f32.mrf.mxu0 }
 0x26b   :  { %323 = vst.msk [vmem:[#allocation7] sm:$0x3] %vm322_vm2, %v319_v47 }
 0x26c   :  { %511 = shalt.err (!%p508_p0)
}
 0x26d   :  { %333 = dma.vmem_to_hbm [thread:$0]  %s331_s25, 32, %s731_s7, [#allocation4]  }
 0x26e   :  { %524 = dma.done.wait [#allocation4], 32  }
 0x26f   :  { %525 = vsyncadd [#allocation4], 4294967264 }
 0x270   :  { %337 = vsyncpa [#allocation3], 1 }
 0x271   :  { %338 = vsyncpa [#allocation6], 1 }
 0x272   :  { %339 = vsyncpa [#allocation4], 1 }

</bundles_post_ra>
